<compile_context>
chip_gen: v7x
topology: tpu7x:2x2x1
jax: 0.10.0
libtpu: 0.0.40
codegen_flags: <defaults>
</compile_context>

<pallas_src>
import math
from functools import partial

import jax
import jax.numpy as jnp
from jax import lax
from jax.experimental import pallas as pl
from jax.experimental.pallas import tpu as pltpu

# ---- model hyperparameters (small, consistent with the module) ----
D_EMBEDDING = 32
NUM_HEAD = 4
D_FF = 64
SEQ = 8
BATCH = 2
HEAD_DIM = D_EMBEDDING // NUM_HEAD


def _decoder_kernel(x_ref, w_ref, b_ref, o_ref, *, n_batch, n_heads):
    # x_ref: (T, E) tokens, T = L * n_batch; token t = (l = t // n_batch, b = t % n_batch)
    x = x_ref[...]
    t_tok, e = x.shape
    hd = e // n_heads
    f = (w_ref.shape[1] - 4 * e) // 2     # w_slab columns: 3E | E | F | F

    # ---- fused q/k/v projection: one MXU matmul (scale pre-folded into q cols) ----
    qkv = jnp.dot(x, w_ref[:, 0:3 * e],
                  preferred_element_type=jnp.float32) + b_ref[:, 0:3 * e]

    # ---- additive mask: tokens of different batch elements must not attend ----
    rows = lax.broadcasted_iota(jnp.int32, (t_tok, t_tok), 0)
    cols = lax.broadcasted_iota(jnp.int32, (t_tok, t_tok), 1)
    mask = jnp.where((rows % n_batch) == (cols % n_batch), 0.0, -1e30)

    # ---- per-head attention; out-projection accumulated in the loop (no concat) ----
    attn = None
    for h in range(n_heads):
        q_h = qkv[:, h * hd:(h + 1) * hd]                       # (T, hd), pre-scaled
        k_h = qkv[:, e + h * hd:e + (h + 1) * hd]
        v_h = qkv[:, 2 * e + h * hd:2 * e + (h + 1) * hd]
        # contract last dims of both operands (no materialized transpose)
        s = lax.dot_general(q_h, k_h, (((1,), (1,)), ((), ())),
                            preferred_element_type=jnp.float32) + mask
        s = s - jnp.max(s, axis=-1, keepdims=True)
        p = jnp.exp(s)
        p = p * pl.reciprocal(jnp.sum(p, axis=-1, keepdims=True), approx=True)
        ctx = jnp.dot(p, v_h, preferred_element_type=jnp.float32)          # (T, hd)
        wo_h = w_ref[h * hd:(h + 1) * hd, 3 * e:4 * e]                     # (hd, E)
        contrib = jnp.dot(ctx, wo_h, preferred_element_type=jnp.float32)   # (T, E)
        attn = contrib if attn is None else attn + contrib
    attn = attn + b_ref[:, 3 * e:4 * e]                                    # + bo

    # ---- FFN (Conv1d kernel-size 1 == pointwise linear) with residual ----
    w1 = w_ref[:, 4 * e:4 * e + f]                      # (E, F), (in, out)
    w2 = w_ref[:, 4 * e + f:4 * e + 2 * f]              # (E, F), PyTorch (out, in)
    h1 = jnp.maximum(
        jnp.dot(attn, w1, preferred_element_type=jnp.float32)
        + b_ref[:, 4 * e:4 * e + f], 0.0)                                  # (T, F)
    h2 = lax.dot_general(h1, w2, (((1,), (1,)), ((), ())),
                         preferred_element_type=jnp.float32) \
        + b_ref[:, 4 * e + f:4 * e + f + e]                                # (T, E)

    o_ref[...] = attn + h2


@jax.jit
def attn_decoder_forward(x_lne, w_slab, b_slab):
    """x_lne: (L, N, E) float32, seq-first like PyTorch nn.MultiheadAttention."""
    L, N, E = x_lne.shape
    # Flatten (L, N, E) -> (L*N, E): a cheap reshape, no transpose.  Per-token
    # ops are order-agnostic; attention handles batch separation via the mask.
    x_tok = x_lne.reshape(L * N, E)

    out_tok = pl.pallas_call(
        partial(_decoder_kernel, n_batch=N, n_heads=NUM_HEAD),
        out_shape=jax.ShapeDtypeStruct((L * N, E), jnp.float32),
        in_specs=[pl.BlockSpec(memory_space=pltpu.MemorySpace.VMEM),
                  pl.BlockSpec(memory_space=pltpu.MemorySpace.VMEM),
                  pl.BlockSpec(memory_space=pltpu.MemorySpace.VMEM)],
        out_specs=pl.BlockSpec(memory_space=pltpu.MemorySpace.VMEM),
    )(x_tok, w_slab, b_slab)

    return out_tok.reshape(L, N, E)


def make_params(key):
    """Random params in PyTorch layout, packed ONCE into two VMEM slabs."""
    ks = jax.random.split(key, 8)
    E, F, HD = D_EMBEDDING, D_FF, HEAD_DIM
    # nn.MultiheadAttention: in_proj_weight (3E, E), in_proj_bias (3E,)
    in_proj_w = jax.random.normal(ks[0], (3 * E, E), jnp.float32) * 0.1
    in_proj_b = jax.random.normal(ks[1], (3 * E,), jnp.float32) * 0.1
    # out_proj: Linear(E, E)
    wo = jax.random.normal(ks[2], (E, E), jnp.float32) * 0.1
    bo = jax.random.normal(ks[3], (E,), jnp.float32) * 0.1
    # ffn1: Conv1d(E, d_ff, 1) -> weight (d_ff, E, 1) squeezed to (d_ff, E)
    w1 = jax.random.normal(ks[4], (F, E), jnp.float32) * 0.1
    b1 = jax.random.normal(ks[5], (F,), jnp.float32) * 0.1
    # ffn2: Conv1d(d_ff, E, 1)
    w2 = jax.random.normal(ks[6], (E, F), jnp.float32) * 0.1
    b2 = jax.random.normal(ks[7], (E,), jnp.float32) * 0.1

    # Fold the 1/sqrt(head_dim) attention scale into the q columns.
    scale = 1.0 / math.sqrt(HD)
    w_in_t = in_proj_w.T                                 # (E, 3E), (in, out)
    w_in_t = w_in_t.at[:, :E].multiply(scale)
    b_in = in_proj_b.at[:E].multiply(scale)

    # Weight slab (E, 4E+2F): [ w_in^T | wo^T | w1^T | w2 (out,in) ]
    w_slab = jnp.concatenate([w_in_t, wo.T, w1.T, w2], axis=1)
    # Bias slab (1, 4E+F+E): [ b_in | bo | b1 | b2 ]
    b_slab = jnp.concatenate([b_in, bo, b1, b2]).reshape(1, -1)
    return w_slab, b_slab


def reference_forward(x_lne, w_slab, b_slab):
    """Pure-JAX reference (mirrors PyTorch eval-mode semantics), consuming the
    same packed parameters (scale is already folded into the q weights)."""
    E, F, H, HD = D_EMBEDDING, D_FF, NUM_HEAD, HEAD_DIM
    w_in = w_slab[:, :3 * E]
    wo_t = w_slab[:, 3 * E:4 * E]
    w1_t = w_slab[:, 4 * E:4 * E + F]
    w2 = w_slab[:, 4 * E + F:]                           # (E_out, F_in)
    b_in = b_slab[:, :3 * E]
    bo = b_slab[:, 3 * E:4 * E]
    b1 = b_slab[:, 4 * E:4 * E + F]
    b2 = b_slab[:, 4 * E + F:]

    L, N, _ = x_lne.shape
    x = jnp.transpose(x_lne, (1, 0, 2))                  # (N, L, E)
    qkv = x @ w_in + b_in                                # (N, L, 3E)
    q, k, v = qkv[..., :E], qkv[..., E:2 * E], qkv[..., 2 * E:]
    qh = q.reshape(N, L, H, HD).transpose(0, 2, 1, 3)    # scale already folded
    kh = k.reshape(N, L, H, HD).transpose(0, 2, 1, 3)
    vh = v.reshape(N, L, H, HD).transpose(0, 2, 1, 3)
    s = jnp.einsum('nhqd,nhkd->nhqk', qh, kh)
    p = jax.nn.softmax(s, axis=-1)
    o = jnp.einsum('nhqk,nhkd->nhqd', p, vh)
    o = o.transpose(0, 2, 1, 3).reshape(N, L, E)
    attn = o @ wo_t + bo
    h1 = jax.nn.relu(attn @ w1_t + b1)
    out = attn + h1 @ w2.T + b2
    return jnp.transpose(out, (1, 0, 2))                 # (L, N, E)


if __name__ == "__main__":
    key = jax.random.PRNGKey(0)
    k_x, k_p = jax.random.split(key)
    x = jax.random.normal(k_x, (SEQ, BATCH, D_EMBEDDING), jnp.float32)
    w_slab, b_slab = make_params(k_p)

    out = attn_decoder_forward(x, w_slab, b_slab)
    out = jax.block_until_ready(out)

    ref = reference_forward(x, w_slab, b_slab)
    assert out.shape == (SEQ, BATCH, D_EMBEDDING)
    max_err = float(jnp.max(jnp.abs(out - ref)))
    # tolerance accommodates the approximate (EUP) reciprocal in the softmax
    assert bool(jnp.allclose(out, ref, atol=2e-3, rtol=2e-3)), f"max abs err {max_err}"

    print("KERNEL_OK")
</pallas_src>

<mosaic_0001>
module attributes {stable_mosaic.version = 11 : i64} {
  func.func @_decoder_kernel(%arg0: memref<16x32xf32, #tpu.memory_space<vmem>>, %arg1: memref<32x256xf32, #tpu.memory_space<vmem>>, %arg2: memref<1x224xf32, #tpu.memory_space<vmem>>, %arg3: memref<16x32xf32, #tpu.memory_space<vmem>>) attributes {dimension_semantics = [], scalar_prefetch = 0 : i64, scratch_operands = 0 : i64, tpu.core_type = #tpu.core_type<tc>} {
    %c0 = arith.constant 0 : index
    %c0_0 = arith.constant 0 : index
    %0 = vector.load %arg0[%c0, %c0_0] : memref<16x32xf32, #tpu.memory_space<vmem>>, vector<16x32xf32>
    %c0_1 = arith.constant 0 : index
    %c0_2 = arith.constant 0 : index
    %1 = vector.load %arg1[%c0_1, %c0_2] : memref<32x256xf32, #tpu.memory_space<vmem>>, vector<32x96xf32>
    %cst = arith.constant dense<0.000000e+00> : vector<16x96xf32>
    %2 = tpu.matmul %0, %1, %cst {dimension_numbers = #tpu.dot_dimension_numbers<[1], [0], [0], [1], [0, 0, 1, 1], [], []>} : vector<16x32xf32>, vector<32x96xf32>, vector<16x96xf32> -> vector<16x96xf32>
    %c0_3 = arith.constant 0 : index
    %c0_4 = arith.constant 0 : index
    %3 = vector.load %arg2[%c0_3, %c0_4] : memref<1x224xf32, #tpu.memory_space<vmem>>, vector<1x96xf32>
    %4 = vector.broadcast %3 : vector<1x96xf32> to vector<16x96xf32>
    %5 = arith.addf %2, %4 : vector<16x96xf32>
    %6 = tpu.iota {dimensions = array<i32: 0>} : vector<16x16xi32>
    %7 = tpu.iota {dimensions = array<i32: 1>} : vector<16x16xi32>
    %c2_i32 = arith.constant 2 : i32
    %c0_i32 = arith.constant 0 : i32
    %8 = arith.cmpi eq, %c2_i32, %c0_i32 : i32
    %c1_i32 = arith.constant 1 : i32
    %9 = arith.select %8, %c1_i32, %c2_i32 : i32
    %10 = vector.broadcast %9 : i32 to vector<16x16xi32>
    %11 = arith.remsi %6, %10 : vector<16x16xi32>
    %c0_i32_5 = arith.constant 0 : i32
    %12 = vector.broadcast %c0_i32_5 : i32 to vector<16x16xi32>
    %13 = arith.cmpi ne, %11, %12 : vector<16x16xi32>
    %c0_i32_6 = arith.constant 0 : i32
    %14 = vector.broadcast %c0_i32_6 : i32 to vector<16x16xi32>
    %15 = arith.cmpi slt, %11, %14 : vector<16x16xi32>
    %c0_i32_7 = arith.constant 0 : i32
    %16 = arith.cmpi slt, %9, %c0_i32_7 : i32
    %17 = vector.broadcast %16 : i1 to vector<16x16xi1>
    %18 = vector.broadcast %17 : vector<16x16xi1> to vector<16x16xi1>
    %19 = arith.xori %15, %18 : vector<16x16xi1>
    %20 = arith.andi %19, %13 : vector<16x16xi1>
    %21 = vector.broadcast %9 : i32 to vector<16x16xi32>
    %22 = arith.addi %11, %21 : vector<16x16xi32>
    %23 = arith.select %20, %22, %11 : vector<16x16xi1>, vector<16x16xi32>
    %c2_i32_8 = arith.constant 2 : i32
    %c0_i32_9 = arith.constant 0 : i32
    %24 = arith.cmpi eq, %c2_i32_8, %c0_i32_9 : i32
    %c1_i32_10 = arith.constant 1 : i32
    %25 = arith.select %24, %c1_i32_10, %c2_i32_8 : i32
    %26 = vector.broadcast %25 : i32 to vector<16x16xi32>
    %27 = arith.remsi %7, %26 : vector<16x16xi32>
    %c0_i32_11 = arith.constant 0 : i32
    %28 = vector.broadcast %c0_i32_11 : i32 to vector<16x16xi32>
    %29 = arith.cmpi ne, %27, %28 : vector<16x16xi32>
    %c0_i32_12 = arith.constant 0 : i32
    %30 = vector.broadcast %c0_i32_12 : i32 to vector<16x16xi32>
    %31 = arith.cmpi slt, %27, %30 : vector<16x16xi32>
    %c0_i32_13 = arith.constant 0 : i32
    %32 = arith.cmpi slt, %25, %c0_i32_13 : i32
    %33 = vector.broadcast %32 : i1 to vector<16x16xi1>
    %34 = vector.broadcast %33 : vector<16x16xi1> to vector<16x16xi1>
    %35 = arith.xori %31, %34 : vector<16x16xi1>
    %36 = arith.andi %35, %29 : vector<16x16xi1>
    %37 = vector.broadcast %25 : i32 to vector<16x16xi32>
    %38 = arith.addi %27, %37 : vector<16x16xi32>
    %39 = arith.select %36, %38, %27 : vector<16x16xi1>, vector<16x16xi32>
    %40 = arith.cmpi eq, %23, %39 : vector<16x16xi32>
    %cst_14 = arith.constant 0.000000e+00 : f32
    %cst_15 = arith.constant -1.000000e+30 : f32
    %41 = vector.broadcast %cst_14 : f32 to vector<16x16xf32>
    %42 = vector.broadcast %cst_15 : f32 to vector<16x16xf32>
    %43 = arith.select %40, %41, %42 : vector<16x16xi1>, vector<16x16xf32>
    %44 = vector.extract_strided_slice %5 {offsets = [0, 0], sizes = [16, 8], strides = [1, 1]} : vector<16x96xf32> to vector<16x8xf32>
    %45 = vector.extract_strided_slice %5 {offsets = [0, 32], sizes = [16, 8], strides = [1, 1]} : vector<16x96xf32> to vector<16x8xf32>
    %46 = vector.extract_strided_slice %5 {offsets = [0, 64], sizes = [16, 8], strides = [1, 1]} : vector<16x96xf32> to vector<16x8xf32>
    %cst_16 = arith.constant dense<0.000000e+00> : vector<16x16xf32>
    %47 = tpu.matmul %44, %45, %cst_16 {dimension_numbers = #tpu.dot_dimension_numbers<[1], [1], [0], [0], [0, 0, 1, 0], [], []>} : vector<16x8xf32>, vector<16x8xf32>, vector<16x16xf32> -> vector<16x16xf32>
    %48 = arith.addf %47, %43 : vector<16x16xf32>
    %cst_17 = arith.constant dense<0xFF800000> : vector<16xf32>
    %49 = vector.multi_reduction <maximumf>, %48, %cst_17 [1] : vector<16x16xf32> to vector<16xf32>
    %50 = vector.shape_cast %49 : vector<16xf32> to vector<16x1xf32>
    %51 = vector.broadcast %50 : vector<16x1xf32> to vector<16x16xf32>
    %52 = arith.subf %48, %51 : vector<16x16xf32>
    %53 = math.exp %52 : vector<16x16xf32>
    %cst_18 = arith.constant dense<0.000000e+00> : vector<16xf32>
    %54 = vector.multi_reduction <add>, %53, %cst_18 [1] : vector<16x16xf32> to vector<16xf32>
    %55 = vector.shape_cast %54 : vector<16xf32> to vector<16x1xf32>
    %56 = tpu.reciprocal %55 {approx = true} : vector<16x1xf32> -> vector<16x1xf32>
    %57 = vector.broadcast %56 : vector<16x1xf32> to vector<16x16xf32>
    %58 = arith.mulf %53, %57 : vector<16x16xf32>
    %cst_19 = arith.constant dense<0.000000e+00> : vector<16x8xf32>
    %59 = tpu.matmul %58, %46, %cst_19 {dimension_numbers = #tpu.dot_dimension_numbers<[1], [0], [0], [1], [0, 0, 1, 1], [], []>} : vector<16x16xf32>, vector<16x8xf32>, vector<16x8xf32> -> vector<16x8xf32>
    %c0_20 = arith.constant 0 : index
    %c96 = arith.constant 96 : index
    %60 = vector.load %arg1[%c0_20, %c96] : memref<32x256xf32, #tpu.memory_space<vmem>>, vector<8x32xf32>
    %cst_21 = arith.constant dense<0.000000e+00> : vector<16x32xf32>
    %61 = tpu.matmul %59, %60, %cst_21 {dimension_numbers = #tpu.dot_dimension_numbers<[1], [0], [0], [1], [0, 0, 1, 1], [], []>} : vector<16x8xf32>, vector<8x32xf32>, vector<16x32xf32> -> vector<16x32xf32>
    %62 = vector.extract_strided_slice %5 {offsets = [0, 8], sizes = [16, 8], strides = [1, 1]} : vector<16x96xf32> to vector<16x8xf32>
    %63 = vector.extract_strided_slice %5 {offsets = [0, 40], sizes = [16, 8], strides = [1, 1]} : vector<16x96xf32> to vector<16x8xf32>
    %64 = vector.extract_strided_slice %5 {offsets = [0, 72], sizes = [16, 8], strides = [1, 1]} : vector<16x96xf32> to vector<16x8xf32>
    %cst_22 = arith.constant dense<0.000000e+00> : vector<16x16xf32>
    %65 = tpu.matmul %62, %63, %cst_22 {dimension_numbers = #tpu.dot_dimension_numbers<[1], [1], [0], [0], [0, 0, 1, 0], [], []>} : vector<16x8xf32>, vector<16x8xf32>, vector<16x16xf32> -> vector<16x16xf32>
    %66 = arith.addf %65, %43 : vector<16x16xf32>
    %cst_23 = arith.constant dense<0xFF800000> : vector<16xf32>
    %67 = vector.multi_reduction <maximumf>, %66, %cst_23 [1] : vector<16x16xf32> to vector<16xf32>
    %68 = vector.shape_cast %67 : vector<16xf32> to vector<16x1xf32>
    %69 = vector.broadcast %68 : vector<16x1xf32> to vector<16x16xf32>
    %70 = arith.subf %66, %69 : vector<16x16xf32>
    %71 = math.exp %70 : vector<16x16xf32>
    %cst_24 = arith.constant dense<0.000000e+00> : vector<16xf32>
    %72 = vector.multi_reduction <add>, %71, %cst_24 [1] : vector<16x16xf32> to vector<16xf32>
    %73 = vector.shape_cast %72 : vector<16xf32> to vector<16x1xf32>
    %74 = tpu.reciprocal %73 {approx = true} : vector<16x1xf32> -> vector<16x1xf32>
    %75 = vector.broadcast %74 : vector<16x1xf32> to vector<16x16xf32>
    %76 = arith.mulf %71, %75 : vector<16x16xf32>
    %cst_25 = arith.constant dense<0.000000e+00> : vector<16x8xf32>
    %77 = tpu.matmul %76, %64, %cst_25 {dimension_numbers = #tpu.dot_dimension_numbers<[1], [0], [0], [1], [0, 0, 1, 1], [], []>} : vector<16x16xf32>, vector<16x8xf32>, vector<16x8xf32> -> vector<16x8xf32>
    %c8 = arith.constant 8 : index
    %c96_26 = arith.constant 96 : index
    %78 = vector.load %arg1[%c8, %c96_26] : memref<32x256xf32, #tpu.memory_space<vmem>>, vector<8x32xf32>
    %cst_27 = arith.constant dense<0.000000e+00> : vector<16x32xf32>
    %79 = tpu.matmul %77, %78, %cst_27 {dimension_numbers = #tpu.dot_dimension_numbers<[1], [0], [0], [1], [0, 0, 1, 1], [], []>} : vector<16x8xf32>, vector<8x32xf32>, vector<16x32xf32> -> vector<16x32xf32>
    %80 = arith.addf %61, %79 : vector<16x32xf32>
    %81 = vector.extract_strided_slice %5 {offsets = [0, 16], sizes = [16, 8], strides = [1, 1]} : vector<16x96xf32> to vector<16x8xf32>
    %82 = vector.extract_strided_slice %5 {offsets = [0, 48], sizes = [16, 8], strides = [1, 1]} : vector<16x96xf32> to vector<16x8xf32>
    %83 = vector.extract_strided_slice %5 {offsets = [0, 80], sizes = [16, 8], strides = [1, 1]} : vector<16x96xf32> to vector<16x8xf32>
    %cst_28 = arith.constant dense<0.000000e+00> : vector<16x16xf32>
    %84 = tpu.matmul %81, %82, %cst_28 {dimension_numbers = #tpu.dot_dimension_numbers<[1], [1], [0], [0], [0, 0, 1, 0], [], []>} : vector<16x8xf32>, vector<16x8xf32>, vector<16x16xf32> -> vector<16x16xf32>
    %85 = arith.addf %84, %43 : vector<16x16xf32>
    %cst_29 = arith.constant dense<0xFF800000> : vector<16xf32>
    %86 = vector.multi_reduction <maximumf>, %85, %cst_29 [1] : vector<16x16xf32> to vector<16xf32>
    %87 = vector.shape_cast %86 : vector<16xf32> to vector<16x1xf32>
    %88 = vector.broadcast %87 : vector<16x1xf32> to vector<16x16xf32>
    %89 = arith.subf %85, %88 : vector<16x16xf32>
    %90 = math.exp %89 : vector<16x16xf32>
    %cst_30 = arith.constant dense<0.000000e+00> : vector<16xf32>
    %91 = vector.multi_reduction <add>, %90, %cst_30 [1] : vector<16x16xf32> to vector<16xf32>
    %92 = vector.shape_cast %91 : vector<16xf32> to vector<16x1xf32>
    %93 = tpu.reciprocal %92 {approx = true} : vector<16x1xf32> -> vector<16x1xf32>
    %94 = vector.broadcast %93 : vector<16x1xf32> to vector<16x16xf32>
    %95 = arith.mulf %90, %94 : vector<16x16xf32>
    %cst_31 = arith.constant dense<0.000000e+00> : vector<16x8xf32>
    %96 = tpu.matmul %95, %83, %cst_31 {dimension_numbers = #tpu.dot_dimension_numbers<[1], [0], [0], [1], [0, 0, 1, 1], [], []>} : vector<16x16xf32>, vector<16x8xf32>, vector<16x8xf32> -> vector<16x8xf32>
    %c16 = arith.constant 16 : index
    %c96_32 = arith.constant 96 : index
    %97 = vector.load %arg1[%c16, %c96_32] : memref<32x256xf32, #tpu.memory_space<vmem>>, vector<8x32xf32>
    %cst_33 = arith.constant dense<0.000000e+00> : vector<16x32xf32>
    %98 = tpu.matmul %96, %97, %cst_33 {dimension_numbers = #tpu.dot_dimension_numbers<[1], [0], [0], [1], [0, 0, 1, 1], [], []>} : vector<16x8xf32>, vector<8x32xf32>, vector<16x32xf32> -> vector<16x32xf32>
    %99 = arith.addf %80, %98 : vector<16x32xf32>
    %100 = vector.extract_strided_slice %5 {offsets = [0, 24], sizes = [16, 8], strides = [1, 1]} : vector<16x96xf32> to vector<16x8xf32>
    %101 = vector.extract_strided_slice %5 {offsets = [0, 56], sizes = [16, 8], strides = [1, 1]} : vector<16x96xf32> to vector<16x8xf32>
    %102 = vector.extract_strided_slice %5 {offsets = [0, 88], sizes = [16, 8], strides = [1, 1]} : vector<16x96xf32> to vector<16x8xf32>
    %cst_34 = arith.constant dense<0.000000e+00> : vector<16x16xf32>
    %103 = tpu.matmul %100, %101, %cst_34 {dimension_numbers = #tpu.dot_dimension_numbers<[1], [1], [0], [0], [0, 0, 1, 0], [], []>} : vector<16x8xf32>, vector<16x8xf32>, vector<16x16xf32> -> vector<16x16xf32>
    %104 = arith.addf %103, %43 : vector<16x16xf32>
    %cst_35 = arith.constant dense<0xFF800000> : vector<16xf32>
    %105 = vector.multi_reduction <maximumf>, %104, %cst_35 [1] : vector<16x16xf32> to vector<16xf32>
    %106 = vector.shape_cast %105 : vector<16xf32> to vector<16x1xf32>
    %107 = vector.broadcast %106 : vector<16x1xf32> to vector<16x16xf32>
    %108 = arith.subf %104, %107 : vector<16x16xf32>
    %109 = math.exp %108 : vector<16x16xf32>
    %cst_36 = arith.constant dense<0.000000e+00> : vector<16xf32>
    %110 = vector.multi_reduction <add>, %109, %cst_36 [1] : vector<16x16xf32> to vector<16xf32>
    %111 = vector.shape_cast %110 : vector<16xf32> to vector<16x1xf32>
    %112 = tpu.reciprocal %111 {approx = true} : vector<16x1xf32> -> vector<16x1xf32>
    %113 = vector.broadcast %112 : vector<16x1xf32> to vector<16x16xf32>
    %114 = arith.mulf %109, %113 : vector<16x16xf32>
    %cst_37 = arith.constant dense<0.000000e+00> : vector<16x8xf32>
    %115 = tpu.matmul %114, %102, %cst_37 {dimension_numbers = #tpu.dot_dimension_numbers<[1], [0], [0], [1], [0, 0, 1, 1], [], []>} : vector<16x16xf32>, vector<16x8xf32>, vector<16x8xf32> -> vector<16x8xf32>
    %c24 = arith.constant 24 : index
    %c96_38 = arith.constant 96 : index
    %116 = vector.load %arg1[%c24, %c96_38] : memref<32x256xf32, #tpu.memory_space<vmem>>, vector<8x32xf32>
    %cst_39 = arith.constant dense<0.000000e+00> : vector<16x32xf32>
    %117 = tpu.matmul %115, %116, %cst_39 {dimension_numbers = #tpu.dot_dimension_numbers<[1], [0], [0], [1], [0, 0, 1, 1], [], []>} : vector<16x8xf32>, vector<8x32xf32>, vector<16x32xf32> -> vector<16x32xf32>
    %118 = arith.addf %99, %117 : vector<16x32xf32>
    %c0_40 = arith.constant 0 : index
    %c96_41 = arith.constant 96 : index
    %119 = vector.load %arg2[%c0_40, %c96_41] : memref<1x224xf32, #tpu.memory_space<vmem>>, vector<1x32xf32>
    %120 = vector.broadcast %119 : vector<1x32xf32> to vector<16x32xf32>
    %121 = arith.addf %118, %120 : vector<16x32xf32>
    %c0_42 = arith.constant 0 : index
    %c128 = arith.constant 128 : index
    %122 = vector.load %arg1[%c0_42, %c128] : memref<32x256xf32, #tpu.memory_space<vmem>>, vector<32x64xf32>
    %c0_43 = arith.constant 0 : index
    %c192 = arith.constant 192 : index
    %123 = vector.load %arg1[%c0_43, %c192] : memref<32x256xf32, #tpu.memory_space<vmem>>, vector<32x64xf32>
    %cst_44 = arith.constant dense<0.000000e+00> : vector<16x64xf32>
    %124 = tpu.matmul %121, %122, %cst_44 {dimension_numbers = #tpu.dot_dimension_numbers<[1], [0], [0], [1], [0, 0, 1, 1], [], []>} : vector<16x32xf32>, vector<32x64xf32>, vector<16x64xf32> -> vector<16x64xf32>
    %c0_45 = arith.constant 0 : index
    %c128_46 = arith.constant 128 : index
    %125 = vector.load %arg2[%c0_45, %c128_46] : memref<1x224xf32, #tpu.memory_space<vmem>>, vector<1x64xf32>
    %126 = vector.broadcast %125 : vector<1x64xf32> to vector<16x64xf32>
    %127 = arith.addf %124, %126 : vector<16x64xf32>
    %cst_47 = arith.constant 0.000000e+00 : f32
    %128 = vector.broadcast %cst_47 : f32 to vector<16x64xf32>
    %129 = arith.maximumf %127, %128 : vector<16x64xf32>
    %cst_48 = arith.constant dense<0.000000e+00> : vector<16x32xf32>
    %130 = tpu.matmul %129, %123, %cst_48 {dimension_numbers = #tpu.dot_dimension_numbers<[1], [1], [0], [0], [0, 0, 1, 0], [], []>} : vector<16x64xf32>, vector<32x64xf32>, vector<16x32xf32> -> vector<16x32xf32>
    %c0_49 = arith.constant 0 : index
    %c192_50 = arith.constant 192 : index
    %131 = vector.load %arg2[%c0_49, %c192_50] : memref<1x224xf32, #tpu.memory_space<vmem>>, vector<1x32xf32>
    %132 = vector.broadcast %131 : vector<1x32xf32> to vector<16x32xf32>
    %133 = arith.addf %130, %132 : vector<16x32xf32>
    %134 = arith.addf %121, %133 : vector<16x32xf32>
    %c0_51 = arith.constant 0 : index
    %c0_52 = arith.constant 0 : index
    %135 = vector.load %arg3[%c0_51, %c0_52] : memref<16x32xf32, #tpu.memory_space<vmem>>, vector<16x32xf32>
    tpu.vector_store %arg3[%c0_51, %c0_52], %134 {strides = array<i32>} : memref<16x32xf32, #tpu.memory_space<vmem>>, vector<16x32xf32>,
    return
  }
}

</mosaic_0001>

<bundles_post_ra>
// kernel: attn_decoder_forward.1
= control target key start
LH: loop header
LB: loop body
LE: loop exit
PB: predicated region body
PF: predicated region fallthrough
CT: control target
= control target key end

     0   :  { %8 = vsyncpa [#allocation3], 0  ;;  %s2249_s0 = inlined_call_operand.hbm [shape: f32[16,32], index: 0, kind: input, shape index: {}]   ;;  %s2250_s1 = inlined_call_operand.hbm [shape: f32[32,256], index: 1, kind: input, shape index: {}]   ;;  %s2251_s2 = inlined_call_operand.vmem [shape: f32[1,224], index: 2, kind: input, shape index: {}]   ;;  %s2252_s3 = inlined_call_operand.hbm [shape: f32[16,32], index: 3, kind: output, shape index: {}]  }
   0x1   :  { %9 = vsyncpa [#allocation6], 0 }
   0x2   :  { %10 = vsyncpa [#allocation4], 0  ;;  %s2019_s12 = smov [#allocation2]   ;;  %s1947_s16 = scalar_lea.hbm %s2249_s0, 256 }
   0x3   :  { %s16_s13 = sshll.u32 %s2019_s12, 4  ;;  %p1948_p0 = scmp.ne.s32.totalorder %s2249_s0, %s1947_s16  ;;  %s17_s13 = int_to_ptr.vmem [resolvable:$true] %s16_s13 }
   0x4   :  { %p1951_p1 = scmp.lt.u32.totalorder %s1947_s16, %s2249_s0 }
   0x6   :  { %p1953_p2 = pnand %p1951_p1, %p1948_p0 }
   0x8   :  { %1956 = shalt.err (!%p1953_p2)
}
   0x9   :  { %s1957_s21 = scalar_lea.vmem %s17_s13, 256  ;;  %p1962_p4 = scmp.lt.s32.totalorder %s17_s13, %s17_s13 }
   0xa   :  { %p1958_p3 = scmp.ne.s32.totalorder %s17_s13, %s1957_s21  ;;  %p1963_p5 = scmp.lt.s32.totalorder %s1957_s21, %s1957_s21 }
   0xc   :  { %p1964_p6 = por %p1963_p5, %p1962_p4 }
   0xe   :  { %p1965_p7 = pnand %p1964_p6, %p1958_p3 }
  0x10   :  { %1968 = shalt.err (!%p1965_p7)
}
  0x11   :  { %s2020_s22 = smov 128   ;;  %s2021_s23 = smov 8  }
  0x12   :  { %22 = dma.hbm_to_vmem [thread:$0]  %s2249_s0, 256, %s17_s13, [#allocation3], %s2020_s22, %s2020_s22, %s2021_s23  }
  0x13   :  { %s2022_s26 = smov [#allocation5]   ;;  %s1969_s30 = scalar_lea.hbm %s2250_s1, 1024 }
  0x14   :  { %s28_s27 = sshll.u32 %s2022_s26, 4  ;;  %p1970_p8 = scmp.ne.s32.totalorder %s2250_s1, %s1969_s30  ;;  %s29_s27 = int_to_ptr.vmem [resolvable:$true] %s28_s27 }
  0x15   :  { %p1973_p9 = scmp.lt.u32.totalorder %s1969_s30, %s2250_s1 }
  0x17   :  { %p1975_p10 = pnand %p1973_p9, %p1970_p8 }
  0x19   :  { %1978 = shalt.err (!%p1975_p10)
}
  0x1a   :  { %s1979_s8 = scalar_lea.vmem %s29_s27, 1024  ;;  %p1984_p12 = scmp.lt.s32.totalorder %s29_s27, %s29_s27 }
  0x1b   :  { %p1980_p11 = scmp.ne.s32.totalorder %s29_s27, %s1979_s8  ;;  %p1985_p13 = scmp.lt.s32.totalorder %s1979_s8, %s1979_s8 }
  0x1d   :  { %p1986_p0 = por %p1985_p13, %p1984_p12 }
  0x1f   :  { %p1987_p1 = pnand %p1986_p0, %p1980_p11 }
  0x21   :  { %1990 = shalt.err (!%p1987_p1)
}
  0x22   :  { %s2023_s0 = smov 256   ;;  %s2024_s9 = smov 16  }
  0x23   :  { %34 = dma.hbm_to_vmem [thread:$0]  %s2250_s1, 1024, %s29_s27, [#allocation6], %s2023_s0, %s2023_s0, %s2024_s9  }
  0x24   :  { %2013 = dma.done.wait [#allocation3], 256  }
  0x25   :  { %2014 = vsyncadd [#allocation3], 4294967040 }
  0x26   :  { %2015 = dma.done.wait [#allocation6], 1024  }
  0x27   :  { %2016 = vsyncadd [#allocation6], 4294966272  ;;  %vm56_vm0 = vcmask 261120   ;;  %v2086_v0 = vld [vmem:[#allocation5] sm:$0xff]  ;;  %v2088_v1 = vld [vmem:[#allocation5 + $0x10] sm:$0xff]  ;;  %vm189_vm1 = vcmask 64512   ;;  %v138_v31 = vlaneseq }
  0x28   :  { %v2090_v2 = vld [vmem:[#allocation5 + $0x20] sm:$0xff]  ;;  %v1771_v3 = vpack.c.bf16 %v2088_v1, %v2086_v0  ;;  %v2094_v4 = vld [vmem:[#allocation5 + $0x30] sm:$0xff]  ;;  %v44_v7 = vld [vmem:[#allocation2 + $0x8] sm:$0xff]  ;;  %s2025_s13 = smov 120   ;;  %s2026_s14 = smov 96   ;;  %vm273_vm5 = vcmask 130048  }
  0x29   :  { %v43_v5 = vld [vmem:[#allocation2] sm:$0xff]  ;;  %v1775_v6 = vpack.c.bf16 %v2094_v4, %v2090_v2  ;;  %s2027_s15 = smov 88   ;;  %s2028_s16 = smov 112   ;;  %vm2126_vm2 = vmpackc.low %vm189_vm1, %vm189_vm1  ;;  %v139_v32 = vshrl.u32 %v138_v31, 7  ;;  %v142_v34 = vand.u32 127, %v138_v31  ;;  %vm1444_vm6 = vcmask 523264  }
  0x2a   :  { %1670 = vmatprep.mubr.msk.f32.mxu1 %vm56_vm0, %v43_v5  ;;  %1772 = vmatprep.subr.bf16.mxu1 %v1771_v3  ;;  %v2103_v8 = vld [vmem:[%s2251_s2] ss:$0 sm:$0xff]  ;;  %s2029_s17 = smov 80   ;;  %v2030_v38 = vmov -1e+30   ;;  %s2031_s18 = smov 56   ;;  %vm1828_vm7 = vmpackc.low %vm1444_vm6, %vm1444_vm6 }
  0x2b   :  { %1774 = vmatpush3.bf16.msra.mxu1 %v1771_v3  ;;  %v140_v33 = vadd.s32 8, %v139_v32  ;;  %v171_v36 = vand.u32 1, %v142_v34  ;;  %v147_v37 = vand.u32 1, %v139_v32  ;;  %s2032_s19 = smov 72   ;;  %s2033_s20 = smov 64  }
  0x2c   :  { %1776 = vmatprep.subr.bf16.mxu1 %v1775_v6  ;;  %s2034_s21 = smov 104   ;;  %s2035_s24 = smov 32  }
  0x2d   :  { %v154_v35 = vand.u32 1, %v140_v33  ;;  %vm179_vm4 = vcmp.eq.s32.totalorder %v147_v37, %v171_v36  ;;  %s2036_s25 = smov 48   ;;  %s2037_s26 = smov 40  }
  0x2e   :  { %v2150_v40 = vsel %vm179_vm4, 0.0, %v2030_v38  ;;  %s2038_s29 = smov [#allocation7]  }
  0x2f   :  { %1778 = vmatpush3.bf16.msra.mxu1 %v1775_v6  ;;  %vm180_vm3 = vcmp.eq.s32.totalorder %v154_v35, %v171_v36  ;;  %s1543_s30 = sshll.u32 %s2038_s29, 4  ;;  %s1544_s30 = int_to_ptr.vmem [resolvable:$true] %s1543_s30 }
  0x30   :  { %v2148_v39 = vsel %vm180_vm3, 0.0, %v2030_v38  ;;  %p1996_p3 = scmp.lt.s32.totalorder %s1544_s30, %s1544_s30 }
  0x32   :  { %1671 = vmatmul.mubr.msk.f32.vlgmr.msra.gmra.mrb[0].mxu1 %vm56_vm0, %v44_v7 }
 0x105   :  { %v1672_v9 = vpop.f32.mrb[0].mxu1 }
 0x106   :  { %v2106_v10 = vadd.f32 %v1672_v9, %v2103_v8  ;;  %v129_v11 = vpop.f32.mrb[1].mxu1 }
 0x107   :  { %v2109_v12 = vadd.f32 %v2103_v8, %v129_v11 }
 0x109   :  { %384 = vrot.lane.b32.xlu1 %v2109_v12, %s2025_s13  ;;  %1677 = vmatprep.mubr.msk.f32.mxu1 %vm189_vm1, %v2109_v12  ;;  %v2116_v13 = vpack.i.bf16 %v2106_v10, %v2109_v12 }
 0x10b   :  { %1866 = vrot.lane.b32.xlu0 %v2116_v13, %s2026_s14 }
 0x10d   :  { %386 = vrot.lane.b32.xlu1 %v2106_v10, %s2025_s13 }
 0x10f   :  { %1871 = vrot.lane.b32.xlu0 %v2116_v13, %s2027_s15 }
 0x111   :  { %755 = vrot.lane.b32.xlu1 %v2109_v12, %s2028_s16 }
 0x113   :  { %1876 = vrot.lane.b32.xlu0 %v2116_v13, %s2029_s17 }
 0x117   :  { %757 = vrot.lane.b32.xlu0 %v2106_v10, %s2028_s16 }
 0x17b   :  { %v385_v24 = vpop.permute.xlu1 %384 }
 0x17d   :  { %v1867_v14 = vpop.permute.xlu0 %1866 }
 0x17e   :  { %v1869_v15 = vunpack.i.h.bf16 %v1867_v14  ;;  %v1868_v16 = vunpack.i.l.bf16 %v1867_v14 }
 0x17f   :  { %v387_v28 = vpop.permute.xlu1 %386 }
 0x180   :  { %v1779_v18 = vpack.c.bf16 %v1869_v15, %v1868_v16 }
 0x181   :  { %v1872_v19 = vpop.permute.xlu0 %1871 }
 0x182   :  { %v1874_v20 = vunpack.i.h.bf16 %v1872_v19  ;;  %v1873_v21 = vunpack.i.l.bf16 %v1872_v19  ;;  %1781 = vmatprep.subr.msk.bf16.mxu1 %vm2126_vm2, %v1779_v18 }
 0x183   :  { %1784 = vmatpush3.bf16.xpose.msk.msra.mxu1 %vm2126_vm2, %v1779_v18  ;;  %v756_v29 = vpop.permute.xlu1 %755 }
 0x184   :  { %v1789_v22 = vpack.c.bf16 %v1874_v20, %v1873_v21 }
 0x185   :  { %v1877_v23 = vpop.permute.xlu0 %1876 }
 0x186   :  { %v1879_v25 = vunpack.i.h.bf16 %v1877_v23  ;;  %v1878_v26 = vunpack.i.l.bf16 %v1877_v23  ;;  %1791 = vmatprep.subr.msk.bf16.mxu1 %vm2126_vm2, %v1789_v22 }
 0x188   :  { %v1799_v27 = vpack.c.bf16 %v1879_v25, %v1878_v26 }
 0x189   :  { %v758_v30 = vpop.permute.xlu0 %757 }
 0x18a   :  { %1678 = vmatmul.mubr.msk.f32.vlgmr.msra.gmra.mrb[2].mxu1 %vm189_vm1, %v2106_v10 }
 0x18b   :  { %1794 = vmatpush3.bf16.xpose.msk.msra.mxu1 %vm2126_vm2, %v1789_v22  ;;  %1691 = vmatprep.mubr.msk.f32.mxu1 %vm189_vm1, %v385_v24 }
 0x18c   :  { %1801 = vmatprep.subr.msk.bf16.mxu1 %vm2126_vm2, %v1799_v27 }
 0x192   :  { %1692 = vmatmul.mubr.msk.f32.vlgmr.msra.gmra.mrb[4].mxu1 %vm189_vm1, %v387_v28 }
 0x193   :  { %1804 = vmatpush3.bf16.xpose.msk.msra.mxu1 %vm2126_vm2, %v1799_v27  ;;  %1715 = vmatprep.mubr.msk.f32.mxu1 %vm189_vm1, %v756_v29 }
 0x19a   :  { %1716 = vmatmul.mubr.msk.f32.vlgmr.msra.gmra.mrb[6].mxu1 %vm189_vm1, %v758_v30 }
 0x25d   :  { %v1679_v41 = vpop.f32.mrb[2].mxu1 }
 0x25e   :  { %v270_v42 = vadd.f32 %v1679_v41, %v2148_v39  ;;  %v264_v43 = vpop.f32.mrb[3].mxu1 }
 0x25f   :  { %v265_v44 = vadd.f32 %v264_v43, %v2150_v40 }
 0x260   :  { %v277_v45 = vsel %vm273_vm5, %v270_v42, -inf }
 0x261   :  { %278 = vmax.xlane.f32.xlu0 %v277_v45  ;;  %v274_v46 = vsel %vm273_vm5, %v265_v44, -inf }
 0x262   :  { %275 = vmax.xlane.f32.xlu1 %v274_v46 }
 0x265   :  { %v1693_v47 = vpop.f32.mrb[4].mxu1 }
 0x266   :  { %v472_v48 = vadd.f32 %v1693_v47, %v2148_v39  ;;  %v466_v49 = vpop.f32.mrb[5].mxu1 }
 0x267   :  { %v467_v50 = vadd.f32 %v466_v49, %v2150_v40 }
 0x268   :  { %v478_v51 = vsel %vm273_vm5, %v472_v48, -inf }
 0x269   :  { %479 = vmax.xlane.f32.xlu1 %v478_v51  ;;  %v475_v52 = vsel %vm273_vm5, %v467_v50, -inf }
 0x26a   :  { %476 = vmax.xlane.f32.xlu0 %v475_v52 }
 0x26d   :  { %v1717_v53 = vpop.f32.mrb[6].mxu1 }
 0x26e   :  { %v837_v54 = vpop.f32.mrb[7].mxu1  ;;  %v843_v21 = vadd.f32 %v1717_v53, %v2148_v39 }
 0x26f   :  { %v838_v20 = vadd.f32 %v837_v54, %v2150_v40 }
 0x270   :  { %v849_v23 = vsel %vm273_vm5, %v843_v21, -inf }
 0x271   :  { %v846_v22 = vsel %vm273_vm5, %v838_v20, -inf }
 0x2ee   :  { %v279_v55 = vpop.xlane.xlu0 %278 }
 0x2ef   :  { %v281_v56 = vsub.f32 %v270_v42, %v279_v55  ;;  %v276_v57 = vpop.xlane.xlu1 %275 }
 0x2f0   :  { %v280_v58 = vsub.f32 %v265_v44, %v276_v57 }
 0x2f1   :  { %v284_v59 = vmul.f32 1.442695, %v281_v56 }
 0x2f2   :  { %v282_v60 = vmul.f32 1.442695, %v280_v58 }
 0x2f3   :  { %1915 = vpow2.f32 %v284_v59 }
 0x2f4   :  { %1917 = vpow2.f32 %v282_v60 }
 0x2f6   :  { %v480_v61 = vpop.xlane.xlu1 %479 }
 0x2f7   :  { %v482_v62 = vsub.f32 %v472_v48, %v480_v61  ;;  %v477_v63 = vpop.xlane.xlu0 %476 }
 0x2f8   :  { %v481_v3 = vsub.f32 %v467_v50, %v477_v63 }
 0x2f9   :  { %v485_v5 = vmul.f32 1.442695, %v482_v62 }
 0x2fa   :  { %v483_v6 = vmul.f32 1.442695, %v481_v3 }
 0x2fb   :  { %1919 = vpow2.f32 %v485_v5 }
 0x2fc   :  { %1921 = vpow2.f32 %v483_v6 }
 0x2fd   :  { %v1916_v7 = vpop.eup %1915 }
 0x2fe   :  { %v1918_v9 = vpop.eup %1917  ;;  %v289_v11 = vsel %vm273_vm5, %v1916_v7, 0.0 }
 0x2ff   :  { %290 = vadd.xlane.f32.xlu1 %v289_v11  ;;  %v286_v14 = vsel %vm273_vm5, %v1918_v9, 0.0 }
 0x300   :  { %287 = vadd.xlane.f32.xlu0 %v286_v14 }
 0x305   :  { %v2162_v15 = vpop.eup %1919 }
 0x306   :  { %v1922_v16 = vpop.eup %1921  ;;  %v490_v18 = vsel %vm273_vm5, %v2162_v15, 0.0 }
 0x307   :  { %491 = vadd.xlane.f32.xlu1 %v490_v18  ;;  %v487_v19 = vsel %vm273_vm5, %v1922_v16, 0.0 }
 0x308   :  { %488 = vadd.xlane.f32.xlu0 %v487_v19 }
 0x318   :  { %1886 = vrot.lane.b32.xlu1 %v2116_v13, %s2031_s18 }
 0x31c   :  { %1891 = vrot.lane.b32.xlu1 %v2116_v13, %s2032_s19 }
 0x31e   :  { %1881 = vrot.lane.b32.xlu0 %v2116_v13, %s2033_s20 }
 0x320   :  { %1045 = vrot.lane.b32.xlu1 %v2106_v10, %s2034_s21 }
 0x322   :  { %1043 = vrot.lane.b32.xlu0 %v2109_v12, %s2034_s21 }
 0x341   :  { %847 = vmax.xlane.f32.xlu0 %v846_v22 }
 0x344   :  { %850 = vmax.xlane.f32.xlu1 %v849_v23 }
 0x355   :  { %586 = vrot.lane.b32.xlu1 %v2088_v1, %s2035_s24 }
 0x359   :  { %1896 = vrot.lane.b32.xlu1 %v2116_v13, %s2036_s25 }
 0x38c   :  { %v291_v12 = vpop.xlane.xlu1 %290 }
 0x38d   :  { %v288_v10 = vpop.xlane.xlu0 %287 }
 0x38e   :  { %1923 = vrcp.f32 %v288_v10 }
 0x38f   :  { %1925 = vrcp.f32 %v291_v12 }
 0x394   :  { %v492_v24 = vpop.xlane.xlu1 %491 }
 0x395   :  { %v489_v25 = vpop.xlane.xlu0 %488 }
 0x396   :  { %1927 = vrcp.f32 %v489_v25 }
 0x397   :  { %1929 = vrcp.f32 %v492_v24 }
 0x398   :  { %v1924_v26 = vpop.eup %1923  ;;  %v1887_v27 = vpop.permute.xlu1 %1886 }
 0x399   :  { %v1882_v28 = vpop.permute.xlu0 %1881  ;;  %v294_v29 = vmul.f32 %v1924_v26, %v1918_v9  ;;  %v1889_v30 = vunpack.i.h.bf16 %v1887_v27  ;;  %v1888_v31 = vunpack.i.l.bf16 %v1887_v27  ;;  %v1926_v35 = vpop.eup %1925 }
 0x39a   :  { %v1884_v32 = vunpack.i.h.bf16 %v1882_v28  ;;  %v1883_v33 = vunpack.i.l.bf16 %v1882_v28  ;;  %v295_v44 = vmul.f32 %v1926_v35, %v1916_v7 }
 0x39b   :  { %1684 = vmatprep.mubr.msk.f32.mxu0 %vm273_vm5, %v294_v29  ;;  %v1795_v41 = vpack.c.bf16 %v1889_v30, %v1888_v31 }
 0x39c   :  { %v1892_v1 = vpop.permute.xlu1 %1891  ;;  %v1785_v34 = vpack.c.bf16 %v1884_v32, %v1883_v33 }
 0x39d   :  { %v1894_v36 = vunpack.i.h.bf16 %v1892_v1  ;;  %v1893_v37 = vunpack.i.l.bf16 %v1892_v1  ;;  %v1044_v38 = vpop.permute.xlu0 %1043 }
 0x39e   :  { %1786 = vmatprep.subr.bf16.mxu0 %v1785_v34  ;;  %1734 = vmatprep.mubr.msk.f32.mxu1 %vm189_vm1, %v1044_v38 }
 0x39f   :  { %v1809_v42 = vpack.c.bf16 %v1894_v36, %v1893_v37  ;;  %1788 = vmatpush3.bf16.msra.mxu0 %v1785_v34 }
 0x3a0   :  { %v1928_v43 = vpop.eup %1927  ;;  %1796 = vmatprep.subr.bf16.mxu0 %v1795_v41  ;;  %v1046_v48 = vpop.permute.xlu1 %1045 }
 0x3a1   :  { %v1930_v45 = vpop.eup %1929  ;;  %1811 = vmatprep.subr.msk.bf16.mxu1 %vm2126_vm2, %v1809_v42  ;;  %v495_v46 = vmul.f32 %v1928_v43, %v1922_v16 }
 0x3a2   :  { %1685 = vmatmul.mubr.msk.f32.vlgmr.msra.gmra.mrb[0].mxu0 %vm273_vm5, %v295_v44  ;;  %1814 = vmatpush3.bf16.xpose.msk.msra.mxu1 %vm2126_vm2, %v1809_v42  ;;  %v496_v47 = vmul.f32 %v1930_v45, %v2162_v15  ;;  %v1336_v42 = vld [vmem:[#allocation5 + $0x18] sm:$0xff] }
 0x3a3   :  { %1798 = vmatpush3.bf16.msra.mxu0 %v1795_v41  ;;  %1698 = vmatprep.mubr.msk.f32.mxu0 %vm273_vm5, %v495_v46  ;;  %v1335_v41 = vld [vmem:[#allocation5 + $0x8] sm:$0xff] }
 0x3a4   :  { %v1819_v43 = vpack.c.bf16 %v1336_v42, %v1335_v41  ;;  %v1337_v46 = vld [vmem:[#allocation5 + $0x28] sm:$0xff] }
 0x3a6   :  { %1699 = vmatmul.mubr.msk.f32.vlgmr.msra.gmra.mrb[2].mxu0 %vm273_vm5, %v496_v47  ;;  %1820 = vmatprep.subr.bf16.mxu1 %v1819_v43  ;;  %v1338_v47 = vld [vmem:[#allocation5 + $0x38] sm:$0xff] }
 0x3a9   :  { %1735 = vmatmul.mubr.msk.f32.vlgmr.msra.gmra.mrb[8].mxu1 %vm189_vm1, %v1046_v48  ;;  %v1823_v48 = vpack.c.bf16 %v1338_v47, %v1337_v46 }
 0x3aa   :  { %1822 = vmatpush3.bf16.msra.mxu1 %v1819_v43 }
 0x3ab   :  { %1824 = vmatprep.subr.bf16.mxu1 %v1823_v48 }
 0x3ae   :  { %1826 = vmatpush3.bf16.msra.mxu1 %v1823_v48 }
 0x3ce   :  { %v848_v49 = vpop.xlane.xlu0 %847 }
 0x3cf   :  { %v852_v50 = vsub.f32 %v838_v20, %v848_v49  ;;  %v1905_v49 = vpack.i.bf16 %v1336_v42, %v1335_v41 }
 0x3d1   :  { %v851_v51 = vpop.xlane.xlu1 %850  ;;  %v854_v53 = vmul.f32 1.442695, %v852_v50  ;;  %v1910_v50 = vpack.i.bf16 %v1338_v47, %v1337_v46 }
 0x3d2   :  { %v853_v52 = vsub.f32 %v843_v21, %v851_v51 }
 0x3d4   :  { %v856_v54 = vmul.f32 1.442695, %v853_v52 }
 0x3d5   :  { %v587_v55 = vpop.permute.xlu1 %586 }
 0x3d6   :  { %1931 = vpow2.f32 %v856_v54  ;;  %1701 = vmatprep.subr.mxu0 %v587_v55 }
 0x3d7   :  { %1702 = vmatpush3.msra.mxu0 %v587_v55  ;;  %1933 = vpow2.f32 %v854_v53 }
 0x3d9   :  { %v1897_v61 = vpop.permute.xlu1 %1896 }
 0x3da   :  { %v1899_v5 = vunpack.i.h.bf16 %v1897_v61  ;;  %v1898_v6 = vunpack.i.l.bf16 %v1897_v61 }
 0x3dc   :  { %v1805_v11 = vpack.c.bf16 %v1899_v5, %v1898_v6 }
 0x3e0   :  { %v1932_v17 = vpop.eup %1931 }
 0x3e1   :  { %v861_v56 = vsel %vm273_vm5, %v1932_v17, 0.0  ;;  %v1934_v57 = vpop.eup %1933 }
 0x3e2   :  { %862 = vadd.xlane.f32.xlu0 %v861_v56  ;;  %v858_v58 = vsel %vm273_vm5, %v1934_v57, 0.0 }
 0x3e6   :  { %859 = vadd.xlane.f32.xlu0 %v858_v58 }
 0x3fc   :  { %671 = vrot.lane.b32.xlu0 %v2086_v0, %s2035_s24 }
 0x46f   :  { %v863_v59 = vpop.xlane.xlu0 %862 }
 0x473   :  { %v860_v60 = vpop.xlane.xlu0 %859 }
 0x474   :  { %1935 = vrcp.f32 %v860_v60 }
 0x475   :  { %v1686_v62 = vpop.f32.mrb[0].mxu0  ;;  %1937 = vrcp.f32 %v863_v59 }
 0x476   :  { %v374_v63 = vpop.f32.mrb[1].mxu0 }
 0x477   :  { %v672_v3 = vpop.permute.xlu0 %671 }
 0x478   :  { %1706 = vmatprep.subr.mxu0 %v672_v3 }
 0x479   :  { %v1700_v7 = vpop.f32.mrb[2].mxu0 }
 0x47a   :  { %v575_v9 = vpop.f32.mrb[3].mxu0 }
 0x47b   :  { %1703 = vmatprep.mubr.msk.f32.mxu0 %vm189_vm1, %v575_v9 }
 0x47c   :  { %1704 = vmatmul.mubr.msk.f32.vlgmr.msra.gmra.mrb[4].mxu0 %vm189_vm1, %v1700_v7  ;;  %v1736_v14 = vpop.f32.mrb[8].mxu1 }
 0x47d   :  { %1707 = vmatpush3.msra.mxu0 %v672_v3  ;;  %v1131_v0 = vadd.f32 %v1736_v14, %v2148_v39  ;;  %1708 = vmatprep.mubr.msk.f32.mxu0 %vm189_vm1, %v374_v63  ;;  %v1125_v15 = vpop.f32.mrb[9].mxu1  ;;  %v1591_v63 = vld [vmem:[%s2251_s2 + $0x1] ss:$0 sm:$0xff]  ;;  %s1991_s2 = scalar_lea.vmem %s1544_s30, 256 }
 0x47e   :  { %1806 = vmatprep.subr.bf16.mxu0 %v1805_v11  ;;  %v1126_v16 = vadd.f32 %v1125_v15, %v2150_v40  ;;  %v1936_v19 = vpop.eup %1935  ;;  %p1992_p2 = scmp.ne.s32.totalorder %s1544_s30, %s1991_s2  ;;  %p1997_p4 = scmp.lt.s32.totalorder %s1991_s2, %s1991_s2 }
 0x47f   :  { %v1137_v18 = vsel %vm273_vm5, %v1131_v0, -inf  ;;  %v1938_v21 = vpop.eup %1937  ;;  %v866_v22 = vmul.f32 %v1936_v19, %v1934_v57 }
 0x480   :  { %1138 = vmax.xlane.f32.xlu0 %v1137_v18  ;;  %v1134_v20 = vsel %vm273_vm5, %v1126_v16, -inf  ;;  %v867_v39 = vmul.f32 %v1938_v21, %v1932_v17  ;;  %p1998_p5 = por %p1997_p4, %p1996_p3 }
 0x481   :  { %1135 = vmax.xlane.f32.xlu1 %v1134_v20 }
 0x482   :  { %p1999_p6 = pnand %p1998_p5, %p1992_p2 }
 0x484   :  { %1709 = vmatmul.mubr.msk.f32.vlgmr.msra.gmra.mrb[4].mxu0 %vm189_vm1, %v1686_v62 }
 0x485   :  { %1808 = vmatpush3.bf16.msra.mxu0 %v1805_v11  ;;  %1722 = vmatprep.mubr.msk.f32.mxu0 %vm273_vm5, %v866_v22 }
 0x488   :  { %1723 = vmatmul.mubr.msk.f32.vlgmr.msra.gmra.mrb[6].mxu0 %vm273_vm5, %v867_v39 }
 0x50d   :  { %v1139_v23 = vpop.xlane.xlu0 %1138 }
 0x50e   :  { %v1141_v10 = vsub.f32 %v1131_v0, %v1139_v23  ;;  %v1136_v40 = vpop.xlane.xlu1 %1135 }
 0x50f   :  { %v1140_v12 = vsub.f32 %v1126_v16, %v1136_v40 }
 0x510   :  { %v1144_v24 = vmul.f32 1.442695, %v1141_v10 }
 0x511   :  { %v1142_v25 = vmul.f32 1.442695, %v1140_v12 }
 0x512   :  { %1939 = vpow2.f32 %v1144_v24 }
 0x513   :  { %1941 = vpow2.f32 %v1142_v25 }
 0x51c   :  { %v1940_v26 = vpop.eup %1939 }
 0x51d   :  { %v1942_v27 = vpop.eup %1941  ;;  %v1149_v28 = vsel %vm273_vm5, %v1940_v26, 0.0 }
 0x51e   :  { %1150 = vadd.xlane.f32.xlu1 %v1149_v28  ;;  %v1146_v29 = vsel %vm273_vm5, %v1942_v27, 0.0 }
 0x51f   :  { %1147 = vadd.xlane.f32.xlu0 %v1146_v29 }
 0x52f   :  { %1901 = vrot.lane.b32.xlu1 %v2116_v13, %s2037_s26 }
 0x533   :  { %1244 = vrot.lane.b32.xlu1 %v2094_v4, %s2035_s24 }
 0x535   :  { %957 = vrot.lane.b32.xlu0 %v2090_v2, %s2035_s24 }
 0x537   :  { %1906 = vrot.lane.b32.xlu1 %v1905_v49, %s2033_s20 }
 0x539   :  { %1330 = vrot.lane.b32.xlu0 %v2103_v8, %s2035_s24 }
 0x53b   :  { %1441 = vrot.lane.b32.xlu1 %v1591_v63, %s2033_s20 }
 0x53d   :  { %1911 = vrot.lane.b32.xlu0 %v1910_v50, %s2033_s20 }
 0x55b   :  { %v1724_v30 = vpop.f32.mrb[6].mxu0 }
 0x55c   :  { %v946_v31 = vpop.f32.mrb[7].mxu0 }
 0x55d   :  { %1727 = vmatprep.mubr.msk.f32.mxu0 %vm189_vm1, %v946_v31 }
 0x5ab   :  { %v1151_v32 = vpop.xlane.xlu1 %1150 }
 0x5ac   :  { %1943 = vrcp.f32 %v1151_v32  ;;  %v1148_v33 = vpop.xlane.xlu0 %1147 }
 0x5ad   :  { %1945 = vrcp.f32 %v1148_v33 }
 0x5af   :  { %v1902_v1 = vpop.permute.xlu1 %1901 }
 0x5b0   :  { %v1904_v34 = vunpack.i.h.bf16 %v1902_v1  ;;  %v1903_v13 = vunpack.i.l.bf16 %v1902_v1  ;;  %v958_v35 = vpop.permute.xlu0 %957 }
 0x5b1   :  { %1725 = vmatprep.subr.mxu0 %v958_v35 }
 0x5b2   :  { %v1815_v4 = vpack.c.bf16 %v1904_v34, %v1903_v13  ;;  %1726 = vmatpush3.msra.mxu0 %v958_v35 }
 0x5b3   :  { %1728 = vmatmul.mubr.msk.f32.vlgmr.msra.gmra.mrb[4].mxu0 %vm189_vm1, %v1724_v30  ;;  %v1245_v2 = vpop.permute.xlu1 %1244 }
 0x5b4   :  { %1816 = vmatprep.subr.bf16.mxu0 %v1815_v4  ;;  %v1331_v51 = vpop.permute.xlu0 %1330 }
 0x5b5   :  { %1818 = vmatpush3.bf16.msra.mxu0 %v1815_v4 }
 0x5b6   :  { %v1944_v8 = vpop.eup %1943  ;;  %1744 = vmatprep.subr.mxu0 %v1245_v2 }
 0x5b7   :  { %v1946_v36 = vpop.eup %1945  ;;  %v1155_v38 = vmul.f32 %v1944_v8, %v1940_v26  ;;  %v1907_v52 = vpop.permute.xlu1 %1906 }
 0x5b8   :  { %v1154_v37 = vmul.f32 %v1946_v36, %v1942_v27  ;;  %v1912_v53 = vpop.permute.xlu0 %1911  ;;  %v1909_v54 = vunpack.i.h.bf16 %v1907_v52  ;;  %v1908_v55 = vunpack.i.l.bf16 %v1907_v52 }
 0x5b9   :  { %v1914_v17 = vunpack.i.h.bf16 %v1912_v53  ;;  %v1913_v56 = vunpack.i.l.bf16 %v1912_v53 }
 0x5ba   :  { %1741 = vmatprep.mubr.msk.f32.mxu0 %vm273_vm5, %v1154_v37  ;;  %v1827_v57 = vpack.c.bf16 %v1909_v54, %v1908_v55 }
 0x5bb   :  { %1742 = vmatmul.mubr.msk.f32.vlgmr.msra.gmra.mrb[8].mxu0 %vm273_vm5, %v1155_v38  ;;  %v1833_v58 = vpack.c.bf16 %v1914_v17, %v1913_v56  ;;  %v1442_v14 = vpop.permute.xlu1 %1441 }
 0x5bc   :  { %1745 = vmatpush3.msra.mxu0 %v1245_v2 }
 0x5bd   :  { %1829 = vmatprep.subr.msk.bf16.mxu0 %vm1828_vm7, %v1827_v57 }
 0x68e   :  { %v1743_v44 = vpop.f32.mrb[8].mxu0 }
 0x68f   :  { %v1234_v45 = vpop.f32.mrb[9].mxu0 }
 0x690   :  { %1746 = vmatprep.mubr.msk.f32.mxu0 %vm189_vm1, %v1234_v45 }
 0x691   :  { %1747 = vmatmul.mubr.msk.f32.vlgmr.msra.gmra.mrb[4].mxu0 %vm189_vm1, %v1743_v44 }
 0x692   :  { %1832 = vmatpush3.bf16.xpose.msk.msra.mxu0 %vm1828_vm7, %v1827_v57 }
 0x693   :  { %1835 = vmatprep.subr.msk.bf16.mxu0 %vm1828_vm7, %v1833_v58 }
 0x69a   :  { %1838 = vmatpush3.bf16.xpose.msk.msra.mxu0 %vm1828_vm7, %v1833_v58 }
 0x764   :  { %v1748_v59 = vpop.f32.mrb[4].mxu0 }
 0x765   :  { %v1319_v60 = vpop.f32.mrb[5].mxu0  ;;  %v1334_v62 = vadd.f32 %v1748_v59, %v1331_v51 }
 0x766   :  { %v1333_v61 = vadd.f32 %v1331_v51, %v1319_v60 }
 0x768   :  { %1757 = vmatprep.mubr.msk.f32.mxu1 %vm56_vm0, %v1333_v61 }
 0x769   :  { %1758 = vmatmul.mubr.msk.f32.vlgmr.msra.gmra.mrb[10].mxu1 %vm56_vm0, %v1334_v62 }
 0x83c   :  { %v1759_v3 = vpop.f32.mrb[10].mxu1 }
 0x83d   :  { %v1424_v5 = vadd.f32 %v1759_v3, %v1591_v63  ;;  %v1418_v6 = vpop.f32.mrb[11].mxu1 }
 0x83e   :  { %v1419_v7 = vadd.f32 %v1591_v63, %v1418_v6 }
 0x83f   :  { %v1428_v11 = vmax.f32 %v1424_v5, 0.0 }
 0x840   :  { %v1427_v9 = vmax.f32 %v1419_v7, 0.0 }
 0x842   :  { %1768 = vmatprep.mubr.msk.f32.mxu0 %vm1444_vm6, %v1427_v9 }
 0x843   :  { %1769 = vmatmul.mubr.msk.f32.vlgmr.msra.gmra.mrb[10].mxu0 %vm1444_vm6, %v1428_v11 }
 0x916   :  { %v1770_v0 = vpop.f32.mrb[10].mxu0 }
 0x917   :  { %v1531_v15 = vadd.f32 %v1770_v0, %v1442_v14  ;;  %v1525_v16 = vpop.f32.mrb[11].mxu0 }
 0x918   :  { %v1526_v18 = vadd.f32 %v1525_v16, %v1442_v14 }
 0x919   :  { %v1535_v19 = vadd.f32 %v1531_v15, %v1334_v62 }
 0x91a   :  { %v1534_v20 = vadd.f32 %v1526_v18, %v1333_v61 }
 0x91b   :  { %1537 = vst.msk [vmem:[#allocation7 + $0x8] sm:$0xff] %vm56_vm0, %v1535_v19 }
 0x91c   :  { %1536 = vst.msk [vmem:[#allocation7] sm:$0xff] %vm56_vm0, %v1534_v20 }
 0x91d   :  { %2002 = shalt.err (!%p1999_p6)
}
 0x91e   :  { %s2003_s6 = scalar_lea.hbm %s2252_s3, 256 }
 0x91f   :  { %p2004_p7 = scmp.ne.s32.totalorder %s2252_s3, %s2003_s6  ;;  %p2007_p8 = scmp.lt.u32.totalorder %s2003_s6, %s2252_s3 }
 0x921   :  { %p2009_p9 = pnand %p2007_p8, %p2004_p7 }
 0x923   :  { %2012 = shalt.err (!%p2009_p9)
}
 0x924   :  { %1549 = dma.vmem_to_hbm [thread:$0]  %s1544_s30, 256, %s2252_s3, [#allocation4], %s2020_s22, %s2020_s22, %s2021_s23  }
 0x925   :  { %2017 = dma.done.wait [#allocation4], 256  }
 0x926   :  { %2018 = vsyncadd [#allocation4], 4294967040 }
 0x927   :  { %1553 = vsyncpa [#allocation3], 1 }
 0x928   :  { %1554 = vsyncpa [#allocation6], 1 }
 0x929   :  { %1555 = vsyncpa [#allocation4], 1 }

</bundles_post_ra>
